<compile_context>
chip_gen: v7x
topology: tpu7x:2x2x1
jax: 0.10.0
libtpu: 0.0.40
codegen_flags: <defaults>
</compile_context>

<pallas_src>
import functools

import jax
import jax.numpy as jnp
from jax.experimental import pallas as pl
from jax.experimental.pallas import tpu as pltpu

IN_DIM = 226
IN_PAD = 256          # padded contraction dim for the first matmul
HID_DIM = 128
OUT_DIM = 4
OUT_PAD = 128         # padded head width -> lane-dense output stores
NEG_SLOPE = 0.1
MAX_TB = 512          # batch tile (f32 outputs; amortizes ~0.35us/step overhead)


def _leaky_relu(x, slope):
    # Keep the elementwise math in f32 (dot already accumulates in f32); avoids
    # a bf16 VPU path that v5e cannot execute natively.
    return jnp.where(x > 0, x, slope * x)


def mlp_kernel(x_ref, w1_ref, b1_ref, w2_ref, b2_ref, w3_ref, b3_ref,
               out_ref, emb_ref):
    """Fused forward for one batch tile: (Linear -> LeakyReLU) x2 -> Linear.

    x/w are bf16 (MXU inputs), all accumulation / bias / activation in f32,
    outputs stored in f32 with lane-dense (multiple of 128) last dims.
    """
    x = x_ref[...]                                    # (TB, IN_PAD) bf16

    h1 = jnp.dot(x, w1_ref[...], preferred_element_type=jnp.float32) + b1_ref[...]
    h1 = _leaky_relu(h1, NEG_SLOPE)                   # (TB, HID) f32

    h2 = jnp.dot(h1.astype(jnp.bfloat16), w2_ref[...],
                 preferred_element_type=jnp.float32) + b2_ref[...]
    h2 = _leaky_relu(h2, NEG_SLOPE)                   # (TB, HID) f32

    out = jnp.dot(h2.astype(jnp.bfloat16), w3_ref[...],
                  preferred_element_type=jnp.float32) + b3_ref[...]  # (TB, OUT_PAD)

    emb_ref[...] = h2.astype(emb_ref.dtype)
    out_ref[...] = out.astype(out_ref.dtype)


@functools.partial(jax.jit, static_argnames=("last",))
def custom_model_forward(x, params, last=False):
    """Mirrors CustomModel.forward (`freeze` only affects autograd -> no-op here).

    params: (w1, b1, w2, b2, w3, b3), weights stored as [in, out] (transposed
    vs. nn.Linear), biases as (1, out), all float32.
    """
    w1, b1, w2, b2, w3, b3 = params
    B = x.shape[0]

    # --- batch tiling: multiple of 16 (bf16 sublane packing), capped at MAX_TB.
    tb = min(MAX_TB, max(16, ((B + 15) // 16) * 16))
    b_pad = ((B + tb - 1) // tb) * tb

    # --- pad + cast inputs/weights (zero padding keeps results exact).
    x_p = jnp.zeros((b_pad, IN_PAD), jnp.float32)
    x_p = x_p.at[:B, :IN_DIM].set(x).astype(jnp.bfloat16)

    w1_p = jnp.zeros((IN_PAD, HID_DIM), jnp.float32)
    w1_p = w1_p.at[:IN_DIM, :].set(w1).astype(jnp.bfloat16)
    w2_b = w2.astype(jnp.bfloat16)

    w3_p = jnp.zeros((HID_DIM, OUT_PAD), jnp.float32)
    w3_p = w3_p.at[:, :OUT_DIM].set(w3).astype(jnp.bfloat16)
    b3_p = jnp.zeros((1, OUT_PAD), jnp.float32).at[:, :OUT_DIM].set(b3)

    grid = (b_pad // tb,)

    out_pad, emb_pad = pl.pallas_call(
        mlp_kernel,
        out_shape=(
            jax.ShapeDtypeStruct((b_pad, OUT_PAD), jnp.float32),   # last_layer (padded)
            jax.ShapeDtypeStruct((b_pad, HID_DIM), jnp.float32),   # embedding
        ),
        grid=grid,
        in_specs=[
            pl.BlockSpec((tb, IN_PAD), lambda i: (i, 0)),          # x tile
            pl.BlockSpec((IN_PAD, HID_DIM), lambda i: (0, 0)),     # w1 (resident)
            pl.BlockSpec((1, HID_DIM), lambda i: (0, 0)),          # b1
            pl.BlockSpec((HID_DIM, HID_DIM), lambda i: (0, 0)),    # w2
            pl.BlockSpec((1, HID_DIM), lambda i: (0, 0)),          # b2
            pl.BlockSpec((HID_DIM, OUT_PAD), lambda i: (0, 0)),    # w3 (padded)
            pl.BlockSpec((1, OUT_PAD), lambda i: (0, 0)),          # b3 (padded)
        ],
        out_specs=(
            pl.BlockSpec((tb, OUT_PAD), lambda i: (i, 0)),
            pl.BlockSpec((tb, HID_DIM), lambda i: (i, 0)),
        ),
        compiler_params=pltpu.CompilerParams(
            dimension_semantics=("parallel",)),                     # megacore on v7x
    )(x_p, w1_p, b1, w2_b, b2, w3_p, b3_p)

    out = out_pad[:B, :OUT_DIM]
    emb = emb_pad[:B, :]
    if last:
        return out, emb
    return out


def init_params(key):
    """Deterministic init matching nn.Linear shapes (stored as [in, out])."""
    ks = jax.random.split(key, 6)

    def linear(kw, kb, fan_in, fan_out):
        bound = 1.0 / jnp.sqrt(fan_in)
        w = jax.random.uniform(kw, (fan_in, fan_out), jnp.float32, -bound, bound)
        b = jax.random.uniform(kb, (1, fan_out), jnp.float32, -bound, bound)
        return w, b

    w1, b1 = linear(ks[0], ks[1], IN_DIM, HID_DIM)
    w2, b2 = linear(ks[2], ks[3], HID_DIM, HID_DIM)
    w3, b3 = linear(ks[4], ks[5], HID_DIM, OUT_DIM)
    return (w1, b1, w2, b2, w3, b3)


def reference_forward(x, params):
    """Pure-JAX reference using the same bf16 input/weight quantization
    (f32 accumulation), so it matches the kernel's numerics closely."""
    w1, b1, w2, b2, w3, b3 = params
    bf = lambda a: a.astype(jnp.bfloat16).astype(jnp.float32)
    h = jax.nn.leaky_relu(bf(x) @ bf(w1) + b1, NEG_SLOPE)
    h = jax.nn.leaky_relu(bf(h) @ bf(w2) + b2, NEG_SLOPE)
    out = bf(h) @ bf(w3) + b3
    return out, h


if __name__ == "__main__":
    key = jax.random.PRNGKey(0)
    k_x, k_p = jax.random.split(key)

    B = 8
    x = jax.random.normal(k_x, (B, IN_DIM), jnp.float32)
    params = init_params(k_p)

    out, emb = custom_model_forward(x, params, last=True)
    jax.block_until_ready((out, emb))

    ref_out, ref_emb = reference_forward(x, params)
    assert out.shape == (B, OUT_DIM)
    assert emb.shape == (B, HID_DIM)
    assert jnp.allclose(out, ref_out, atol=2e-3, rtol=2e-3), \
        float(jnp.max(jnp.abs(out - ref_out)))
    assert jnp.allclose(emb, ref_emb, atol=2e-3, rtol=2e-3), \
        float(jnp.max(jnp.abs(emb - ref_emb)))

    # also exercise the default (last=False) path
    out_only = custom_model_forward(x, params)
    jax.block_until_ready(out_only)
    assert out_only.shape == (B, OUT_DIM)

    print("KERNEL_OK")
</pallas_src>

<mosaic_0001>
module attributes {stable_mosaic.version = 11 : i64} {
  func.func @mlp_kernel(%arg0: i32, %arg1: memref<16x256xbf16, #tpu.memory_space<vmem>>, %arg2: memref<256x128xbf16, #tpu.memory_space<vmem>>, %arg3: memref<1x128xf32, #tpu.memory_space<vmem>>, %arg4: memref<128x128xbf16, #tpu.memory_space<vmem>>, %arg5: memref<1x128xf32, #tpu.memory_space<vmem>>, %arg6: memref<128x128xbf16, #tpu.memory_space<vmem>>, %arg7: memref<1x128xf32, #tpu.memory_space<vmem>>, %arg8: memref<16x128xf32, #tpu.memory_space<vmem>>, %arg9: memref<16x128xf32, #tpu.memory_space<vmem>>) attributes {dimension_semantics = [#tpu.dimension_semantics<parallel>], iteration_bounds = array<i64: 1>, scalar_prefetch = 0 : i64, scratch_operands = 0 : i64, tpu.core_type = #tpu.core_type<tc>, window_params = [{transform_indices = @transform_0, window_bounds = array<i64: 16, 256>}, {pipeline_mode = #tpu.pipeline_mode<synchronous>, transform_indices = @transform_1, window_bounds = array<i64: 256, 128>}, {pipeline_mode = #tpu.pipeline_mode<synchronous>, transform_indices = @transform_2, window_bounds = array<i64: 1, 128>}, {pipeline_mode = #tpu.pipeline_mode<synchronous>, transform_indices = @transform_3, window_bounds = array<i64: 128, 128>}, {pipeline_mode = #tpu.pipeline_mode<synchronous>, transform_indices = @transform_4, window_bounds = array<i64: 1, 128>}, {pipeline_mode = #tpu.pipeline_mode<synchronous>, transform_indices = @transform_5, window_bounds = array<i64: 128, 128>}, {pipeline_mode = #tpu.pipeline_mode<synchronous>, transform_indices = @transform_6, window_bounds = array<i64: 1, 128>}, {transform_indices = @transform_7, window_bounds = array<i64: 16, 128>}, {transform_indices = @transform_8, window_bounds = array<i64: 16, 128>}]} {
    %c0 = arith.constant 0 : index
    %c0_0 = arith.constant 0 : index
    %0 = vector.load %arg1[%c0, %c0_0] : memref<16x256xbf16, #tpu.memory_space<vmem>>, vector<16x256xbf16>
    %c0_1 = arith.constant 0 : index
    %c0_2 = arith.constant 0 : index
    %1 = vector.load %arg2[%c0_1, %c0_2] : memref<256x128xbf16, #tpu.memory_space<vmem>>, vector<256x128xbf16>
    %cst = arith.constant dense<0.000000e+00> : vector<16x128xf32>
    %2 = tpu.matmul %0, %1, %cst {dimension_numbers = #tpu.dot_dimension_numbers<[1], [0], [0], [1], [0, 0, 1, 1], [], []>} : vector<16x256xbf16>, vector<256x128xbf16>, vector<16x128xf32> -> vector<16x128xf32>
    %c0_3 = arith.constant 0 : index
    %c0_4 = arith.constant 0 : index
    %3 = vector.load %arg3[%c0_3, %c0_4] : memref<1x128xf32, #tpu.memory_space<vmem>>, vector<1x128xf32>
    %4 = vector.broadcast %3 : vector<1x128xf32> to vector<16x128xf32>
    %5 = arith.addf %2, %4 : vector<16x128xf32>
    %cst_5 = arith.constant 0.000000e+00 : f32
    %6 = vector.broadcast %cst_5 : f32 to vector<16x128xf32>
    %7 = arith.cmpf ogt, %5, %6 : vector<16x128xf32>
    %cst_6 = arith.constant 1.000000e-01 : f32
    %8 = vector.broadcast %cst_6 : f32 to vector<16x128xf32>
    %9 = arith.mulf %8, %5 : vector<16x128xf32>
    %10 = arith.select %7, %5, %9 : vector<16x128xi1>, vector<16x128xf32>
    %11 = arith.truncf %10 : vector<16x128xf32> to vector<16x128xbf16>
    %c0_7 = arith.constant 0 : index
    %c0_8 = arith.constant 0 : index
    %12 = vector.load %arg4[%c0_7, %c0_8] : memref<128x128xbf16, #tpu.memory_space<vmem>>, vector<128x128xbf16>
    %cst_9 = arith.constant dense<0.000000e+00> : vector<16x128xf32>
    %13 = tpu.matmul %11, %12, %cst_9 {dimension_numbers = #tpu.dot_dimension_numbers<[1], [0], [0], [1], [0, 0, 1, 1], [], []>} : vector<16x128xbf16>, vector<128x128xbf16>, vector<16x128xf32> -> vector<16x128xf32>
    %c0_10 = arith.constant 0 : index
    %c0_11 = arith.constant 0 : index
    %14 = vector.load %arg5[%c0_10, %c0_11] : memref<1x128xf32, #tpu.memory_space<vmem>>, vector<1x128xf32>
    %15 = vector.broadcast %14 : vector<1x128xf32> to vector<16x128xf32>
    %16 = arith.addf %13, %15 : vector<16x128xf32>
    %cst_12 = arith.constant 0.000000e+00 : f32
    %17 = vector.broadcast %cst_12 : f32 to vector<16x128xf32>
    %18 = arith.cmpf ogt, %16, %17 : vector<16x128xf32>
    %cst_13 = arith.constant 1.000000e-01 : f32
    %19 = vector.broadcast %cst_13 : f32 to vector<16x128xf32>
    %20 = arith.mulf %19, %16 : vector<16x128xf32>
    %21 = arith.select %18, %16, %20 : vector<16x128xi1>, vector<16x128xf32>
    %22 = arith.truncf %21 : vector<16x128xf32> to vector<16x128xbf16>
    %c0_14 = arith.constant 0 : index
    %c0_15 = arith.constant 0 : index
    %23 = vector.load %arg6[%c0_14, %c0_15] : memref<128x128xbf16, #tpu.memory_space<vmem>>, vector<128x128xbf16>
    %cst_16 = arith.constant dense<0.000000e+00> : vector<16x128xf32>
    %24 = tpu.matmul %22, %23, %cst_16 {dimension_numbers = #tpu.dot_dimension_numbers<[1], [0], [0], [1], [0, 0, 1, 1], [], []>} : vector<16x128xbf16>, vector<128x128xbf16>, vector<16x128xf32> -> vector<16x128xf32>
    %c0_17 = arith.constant 0 : index
    %c0_18 = arith.constant 0 : index
    %25 = vector.load %arg7[%c0_17, %c0_18] : memref<1x128xf32, #tpu.memory_space<vmem>>, vector<1x128xf32>
    %26 = vector.broadcast %25 : vector<1x128xf32> to vector<16x128xf32>
    %27 = arith.addf %24, %26 : vector<16x128xf32>
    %c0_19 = arith.constant 0 : index
    %c0_20 = arith.constant 0 : index
    %28 = vector.load %arg9[%c0_19, %c0_20] : memref<16x128xf32, #tpu.memory_space<vmem>>, vector<16x128xf32>
    tpu.vector_store %arg9[%c0_19, %c0_20], %21 {strides = array<i32>} : memref<16x128xf32, #tpu.memory_space<vmem>>, vector<16x128xf32>,
    %c0_21 = arith.constant 0 : index
    %c0_22 = arith.constant 0 : index
    %29 = vector.load %arg8[%c0_21, %c0_22] : memref<16x128xf32, #tpu.memory_space<vmem>>, vector<16x128xf32>
    tpu.vector_store %arg8[%c0_21, %c0_22], %27 {strides = array<i32>} : memref<16x128xf32, #tpu.memory_space<vmem>>, vector<16x128xf32>,
    return
  }
  func.func @transform_0(%arg0: i32) -> (i32, i32) {
    %c0_i32 = arith.constant 0 : i32
    %c0_i32_0 = arith.constant 0 : i32
    return %arg0, %c0_i32 : i32, i32
  }
  func.func @transform_1(%arg0: i32) -> (i32, i32) {
    %c0_i32 = arith.constant 0 : i32
    %c0_i32_0 = arith.constant 0 : i32
    %c0_i32_1 = arith.constant 0 : i32
    return %c0_i32, %c0_i32_0 : i32, i32
  }
  func.func @transform_2(%arg0: i32) -> (i32, i32) {
    %c0_i32 = arith.constant 0 : i32
    %c0_i32_0 = arith.constant 0 : i32
    %c0_i32_1 = arith.constant 0 : i32
    return %c0_i32, %c0_i32_0 : i32, i32
  }
  func.func @transform_3(%arg0: i32) -> (i32, i32) {
    %c0_i32 = arith.constant 0 : i32
    %c0_i32_0 = arith.constant 0 : i32
    %c0_i32_1 = arith.constant 0 : i32
    return %c0_i32, %c0_i32_0 : i32, i32
  }
  func.func @transform_4(%arg0: i32) -> (i32, i32) {
    %c0_i32 = arith.constant 0 : i32
    %c0_i32_0 = arith.constant 0 : i32
    %c0_i32_1 = arith.constant 0 : i32
    return %c0_i32, %c0_i32_0 : i32, i32
  }
  func.func @transform_5(%arg0: i32) -> (i32, i32) {
    %c0_i32 = arith.constant 0 : i32
    %c0_i32_0 = arith.constant 0 : i32
    %c0_i32_1 = arith.constant 0 : i32
    return %c0_i32, %c0_i32_0 : i32, i32
  }
  func.func @transform_6(%arg0: i32) -> (i32, i32) {
    %c0_i32 = arith.constant 0 : i32
    %c0_i32_0 = arith.constant 0 : i32
    %c0_i32_1 = arith.constant 0 : i32
    return %c0_i32, %c0_i32_0 : i32, i32
  }
  func.func @transform_7(%arg0: i32) -> (i32, i32) {
    %c0_i32 = arith.constant 0 : i32
    %c0_i32_0 = arith.constant 0 : i32
    return %arg0, %c0_i32 : i32, i32
  }
  func.func @transform_8(%arg0: i32) -> (i32, i32) {
    %c0_i32 = arith.constant 0 : i32
    %c0_i32_0 = arith.constant 0 : i32
    return %arg0, %c0_i32 : i32, i32
  }
}

</mosaic_0001>

<bundles_post_ra>
// kernel: custom_model_forward.1
= control target key start
LH: loop header
LB: loop body
LE: loop exit
PB: predicated region body
PF: predicated region fallthrough
CT: control target
= control target key end

     0   :  { %v621_v1 = vmov 0.0   ;;  %vm622_vm0 = vmmov 0   ;;  %s809_s1 = inlined_call_operand.vmem [shape: bf16[256,128], index: 1, kind: input, shape index: {}]   ;;  %s810_s0 = inlined_call_operand.vmem [shape: bf16[16,256], index: 0, kind: input, shape index: {}]   ;;  %s811_s3 = inlined_call_operand.vmem [shape: bf16[128,128], index: 3, kind: input, shape index: {}]   ;;  %s812_s5 = inlined_call_operand.vmem [shape: bf16[128,128], index: 5, kind: input, shape index: {}]   ;;  %s813_s2 = inlined_call_operand.vmem [shape: f32[1,128], index: 2, kind: input, shape index: {}]   ;;  %s814_s4 = inlined_call_operand.vmem [shape: f32[1,128], index: 4, kind: input, shape index: {}]   ;;  %s815_s8 = inlined_call_operand.vmem [shape: f32[16,128], index: 8, kind: output, shape index: {1}]   ;;  %s816_s6 = inlined_call_operand.vmem [shape: f32[1,128], index: 6, kind: input, shape index: {}]   ;;  %s817_s7 = inlined_call_operand.vmem [shape: f32[16,128], index: 7, kind: output, shape index: {0}]  }
   0x1   :  { %v586_v0 = vld [vmem:[%s809_s1 + $0x40] sm:$0xff]   ;;  %544 = vmatprep.subr.bf16.mxu1 %v621_v1  ;;  %v588_v3 = vld [vmem:[%s809_s1 + $0x48] sm:$0xff]   ;;  %v590_v5 = vld [vmem:[%s809_s1 + $0x50] sm:$0xff]   ;;  %560 = vmatprep.mubr.msk.bf16.mxu1 %vm622_vm0, %v621_v1 }
   0x2   :  { %v587_v2 = vld [vmem:[%s809_s1] sm:$0xff]   ;;  %504 = vmatprep.subr.bf16.mxu0 %v586_v0  ;;  %v589_v4 = vld [vmem:[%s809_s1 + $0x8] sm:$0xff]   ;;  %v591_v6 = vld [vmem:[%s809_s1 + $0x10] sm:$0xff]  }
   0x3   :  { %505 = vmatpush3.bf16.msra.mxu0 %v587_v2  ;;  %v592_v7 = vld [vmem:[%s809_s1 + $0x58] sm:$0xff]   ;;  %v594_v9 = vld [vmem:[%s809_s1 + $0x60] sm:$0xff]   ;;  %v596_v11 = vld [vmem:[%s809_s1 + $0x68] sm:$0xff]  }
   0x4   :  { %506 = vmatprep.subr.bf16.mxu0 %v588_v3  ;;  %v593_v8 = vld [vmem:[%s809_s1 + $0x18] sm:$0xff]   ;;  %v595_v10 = vld [vmem:[%s809_s1 + $0x20] sm:$0xff]   ;;  %v597_v12 = vld [vmem:[%s809_s1 + $0x28] sm:$0xff]  }
   0x5   :  { %v604_v13 = vld [vmem:[%s810_s0 + $0x4] ss:$8 sps:$4 sm:$0xff]   ;;  %v598_v15 = vld [vmem:[%s809_s1 + $0x70] sm:$0xff]   ;;  %v600_v18 = vld [vmem:[%s809_s1 + $0x78] sm:$0xff]  }
   0x6   :  { %v605_v14 = vld [vmem:[%s811_s3] sm:$0xff]   ;;  %208 = vmatprep.mubr.bf16.mxu0 %v604_v13  ;;  %v606_v16 = vld [vmem:[%s811_s3 + $0x8] sm:$0xff]   ;;  %v599_v17 = vld [vmem:[%s809_s1 + $0x30] sm:$0xff]  }
   0x7   :  { %507 = vmatpush3.bf16.msra.mxu0 %v589_v4  ;;  %545 = vmatpush3.bf16.msra.mxu1 %v605_v14  ;;  %v607_v19 = vld [vmem:[%s811_s3 + $0x10] sm:$0xff]   ;;  %v601_v20 = vld [vmem:[%s809_s1 + $0x38] sm:$0xff]   ;;  %v602_v22 = vld [vmem:[%s810_s0] ss:$8 sps:$4 sm:$0xff]  }
   0x8   :  { %508 = vmatprep.subr.bf16.mxu0 %v590_v5  ;;  %546 = vmatprep.subr.bf16.mxu1 %v621_v1  ;;  %v608_v21 = vld [vmem:[%s811_s3 + $0x18] sm:$0xff]   ;;  %v609_v23 = vld [vmem:[%s811_s3 + $0x20] sm:$0xff]   ;;  %v610_v24 = vld [vmem:[%s811_s3 + $0x28] sm:$0xff]  }
   0x9   :  { %v611_v25 = vld [vmem:[%s811_s3 + $0x30] sm:$0xff]   ;;  %v612_v26 = vld [vmem:[%s811_s3 + $0x38] sm:$0xff]   ;;  %v613_v27 = vld [vmem:[%s812_s5] sm:$0xff]  }
   0xa   :  { %v614_v28 = vld [vmem:[%s812_s5 + $0x8] sm:$0xff]   ;;  %v615_v29 = vld [vmem:[%s812_s5 + $0x10] sm:$0xff]   ;;  %v616_v30 = vld [vmem:[%s812_s5 + $0x18] sm:$0xff]  }
   0xb   :  { %509 = vmatpush3.bf16.msra.mxu0 %v591_v6  ;;  %547 = vmatpush3.bf16.msra.mxu1 %v606_v16  ;;  %v617_v31 = vld [vmem:[%s812_s5 + $0x20] sm:$0xff]   ;;  %v618_v32 = vld [vmem:[%s812_s5 + $0x28] sm:$0xff]   ;;  %v619_v47 = vld [vmem:[%s812_s5 + $0x30] sm:$0xff]  }
   0xc   :  { %510 = vmatprep.subr.bf16.mxu0 %v592_v7  ;;  %548 = vmatprep.subr.bf16.mxu1 %v621_v1  ;;  %v467_v34 = vld [vmem:[%s813_s2] ss:$0 sm:$0xff]  ;;  %v620_v48 = vld [vmem:[%s812_s5 + $0x38] sm:$0xff]  }
   0xd   :  { %v486_v49 = vld [vmem:[%s814_s4] ss:$0 sm:$0xff] }
   0xe   :  { %v495_v61 = vld [vmem:[%s816_s6] ss:$0 sm:$0xff] }
   0xf   :  { %511 = vmatpush3.bf16.msra.mxu0 %v593_v8  ;;  %549 = vmatpush3.bf16.msra.mxu1 %v607_v19 }
  0x10   :  { %512 = vmatprep.subr.bf16.mxu0 %v594_v9  ;;  %550 = vmatprep.subr.bf16.mxu1 %v621_v1 }
  0x13   :  { %513 = vmatpush3.bf16.msra.mxu0 %v595_v10  ;;  %551 = vmatpush3.bf16.msra.mxu1 %v608_v21 }
  0x14   :  { %514 = vmatprep.subr.bf16.mxu0 %v596_v11  ;;  %552 = vmatprep.subr.bf16.mxu1 %v621_v1 }
  0x17   :  { %515 = vmatpush3.bf16.msra.mxu0 %v597_v12  ;;  %553 = vmatpush3.bf16.msra.mxu1 %v609_v23 }
  0x18   :  { %516 = vmatprep.subr.bf16.mxu0 %v598_v15  ;;  %554 = vmatprep.subr.bf16.mxu1 %v621_v1 }
  0x1b   :  { %517 = vmatpush3.bf16.msra.mxu0 %v599_v17  ;;  %555 = vmatpush3.bf16.msra.mxu1 %v610_v24 }
  0x1c   :  { %518 = vmatprep.subr.bf16.mxu0 %v600_v18  ;;  %556 = vmatprep.subr.bf16.mxu1 %v621_v1 }
  0x1f   :  { %519 = vmatpush3.bf16.msra.mxu0 %v601_v20  ;;  %557 = vmatpush3.bf16.msra.mxu1 %v611_v25 }
  0x20   :  { %564 = vmatprep.subr.bf16.mxu0 %v621_v1  ;;  %558 = vmatprep.subr.bf16.mxu1 %v621_v1 }
  0x22   :  { %209 = vmatmul.mubr.bf16.vlgmr.msra.gmra.mrb[0].mxu0 %v602_v22 }
  0x23   :  { %580 = vmatprep.mubr.msk.bf16.mxu0 %vm622_vm0, %v621_v1  ;;  %559 = vmatpush3.bf16.msra.mxu1 %v612_v26 }
  0x24   :  { %565 = vmatpush3.bf16.msra.mxu0 %v613_v27 }
  0x25   :  { %566 = vmatprep.subr.bf16.mxu0 %v621_v1 }
  0x28   :  { %567 = vmatpush3.bf16.msra.mxu0 %v614_v28 }
  0x29   :  { %568 = vmatprep.subr.bf16.mxu0 %v621_v1 }
  0x2c   :  { %569 = vmatpush3.bf16.msra.mxu0 %v615_v29 }
  0x2d   :  { %570 = vmatprep.subr.bf16.mxu0 %v621_v1 }
  0x30   :  { %571 = vmatpush3.bf16.msra.mxu0 %v616_v30 }
  0x31   :  { %572 = vmatprep.subr.bf16.mxu0 %v621_v1 }
  0x34   :  { %573 = vmatpush3.bf16.msra.mxu0 %v617_v31 }
  0x35   :  { %574 = vmatprep.subr.bf16.mxu0 %v621_v1 }
  0x38   :  { %575 = vmatpush3.bf16.msra.mxu0 %v618_v32 }
  0x39   :  { %576 = vmatprep.subr.bf16.mxu0 %v621_v1 }
  0x3c   :  { %577 = vmatpush3.bf16.msra.mxu0 %v619_v47 }
  0x3d   :  { %578 = vmatprep.subr.bf16.mxu0 %v621_v1 }
  0x40   :  { %579 = vmatpush3.bf16.msra.mxu0 %v620_v48 }
  0xf5   :  { %v520_v33 = vpop.f32.mrb[0].mxu0 }
  0xf6   :  { %v521_v35 = vpop.f32.mrb[1].mxu0 }
  0xf7   :  { %v522_v36 = vadd.f32 %v521_v35, %v520_v33  ;;  %v523_v37 = vpop.f32.mrb[2].mxu0 }
  0xf8   :  { %v524_v38 = vpop.f32.mrb[3].mxu0 }
  0xf9   :  { %v211_v39 = vadd.f32 %v522_v36, %v467_v34  ;;  %v525_v40 = vadd.f32 %v524_v38, %v523_v37 }
  0xfb   :  { %v219_v41 = vmul.f32 0.1, %v211_v39  ;;  %v214_v42 = vadd.f32 %v525_v40, %v467_v34  ;;  %vm217_vm1 = vcmp.gt.f32.partialorder %v211_v39, 0.0 }
  0xfd   :  { %vm218_vm2 = vcmp.gt.f32.partialorder %v214_v42, 0.0  ;;  %v220_v43 = vmul.f32 0.1, %v214_v42  ;;  %v221_v44 = vsel %vm217_vm1, %v211_v39, %v219_v41 }
  0xff   :  { %v222_v45 = vsel %vm218_vm2, %v214_v42, %v220_v43 }
 0x100   :  { %v223_v46 = vpack.c.bf16 %v222_v45, %v221_v44 }
 0x102   :  { %561 = vmatmul.mubr.bf16.vlgmr.msra.gmra.mrb[0].mxu1 %v223_v46 }
 0x1d5   :  { %v329_v50 = vpop.f32.mrb[0].mxu1 }
 0x1d6   :  { %v330_v51 = vadd.f32 %v486_v49, %v329_v50  ;;  %v562_v52 = vpop.f32.mrb[1].mxu1 }
 0x1d7   :  { %v332_v53 = vpop.f32.mrb[2].mxu1 }
 0x1d8   :  { %vm336_vm3 = vcmp.gt.f32.partialorder %v330_v51, 0.0  ;;  %v338_v54 = vmul.f32 0.1, %v330_v51  ;;  %v333_v55 = vadd.f32 %v486_v49, %v332_v53  ;;  %v563_v56 = vpop.f32.mrb[3].mxu1 }
 0x1da   :  { %v340_v57 = vsel %vm336_vm3, %v330_v51, %v338_v54  ;;  %vm337_vm4 = vcmp.gt.f32.partialorder %v333_v55, 0.0  ;;  %v339_v58 = vmul.f32 0.1, %v333_v55 }
 0x1db   :  { %455 = vst [vmem:[%s815_s8] sm:$0xff] %v340_v57 }
 0x1dc   :  { %v341_v59 = vsel %vm337_vm4, %v333_v55, %v339_v58 }
 0x1dd   :  { %v342_v60 = vpack.c.bf16 %v341_v59, %v340_v57  ;;  %456 = vst [vmem:[%s815_s8 + $0x8] sm:$0xff] %v341_v59 }
 0x1df   :  { %581 = vmatmul.mubr.bf16.vlgmr.msra.gmra.mrb[4].mxu0 %v342_v60 }
 0x2b2   :  { %v448_v62 = vpop.f32.mrb[4].mxu0 }
 0x2b3   :  { %v449_v63 = vadd.f32 %v495_v61, %v448_v62  ;;  %v582_v0 = vpop.f32.mrb[5].mxu0 }
 0x2b4   :  { %v451_v1 = vpop.f32.mrb[6].mxu0 }
 0x2b5   :  { %457 = vst [vmem:[%s817_s7] sm:$0xff] %v449_v63  ;;  %v452_v2 = vadd.f32 %v495_v61, %v451_v1  ;;  %v583_v3 = vpop.f32.mrb[7].mxu0 }
 0x2b7   :  { %458 = vst [vmem:[%s817_s7 + $0x8] sm:$0xff] %v452_v2 }

</bundles_post_ra>
